<compile_context>
chip_gen: v5e
topology: v5e:2x2
jax: 0.10.0
libtpu: 0.0.40
codegen_flags: <defaults>
</compile_context>

<pallas_src>
import jax
import jax.numpy as jnp
from jax import lax
from jax.experimental import pallas as pl
from jax.experimental.pallas import tpu as pltpu

# ---------------------------------------------------------------------------
NNODES = 16      # number of graph nodes
DIM    = 64      # node-embedding dimension
K      = 5       # top-k neighbours kept per row
ALPHA  = 0.5     # tanh saturation rate
_HIGH  = jax.lax.Precision.HIGHEST


# ---------------------------------------------------------------------------
# Fused kernel: embedding gather + both linears + tanh + score matrix +
#               relu(tanh) + per-row top-k masking, all in VMEM.
# ---------------------------------------------------------------------------
def _graph_constructor_kernel(idx_ref, emb_ref, w_ref, b_ref, o_ref):
    n = o_ref.shape[0]
    nnodes, two_d = emb_ref.shape
    d = two_d // 2

    # ---- embedding lookup as a one-hot MXU matmul (fused gather) -----------
    idx = idx_ref[...]                                          # (n, 1) int32
    cols = lax.broadcasted_iota(jnp.int32, (n, nnodes), 1)
    onehot = (cols == idx).astype(jnp.float32)                  # (n, nnodes)
    g = jnp.dot(onehot, emb_ref[...],
                preferred_element_type=jnp.float32, precision=_HIGH)  # (n, 2d)

    # ---- both nn.Linear layers in one block-diagonal dot -------------------
    lin = jnp.dot(g, w_ref[...],
                  preferred_element_type=jnp.float32, precision=_HIGH)
    nv = jnp.tanh(ALPHA * (lin + b_ref[...]))                   # (n, 2d)
    nv1 = nv[:, :d]
    nv2 = nv[:, d:]

    # ---- a = nv1 @ nv2.T - nv2 @ nv1.T  (NT dots, no materialized transpose)
    nt = (((1,), (1,)), ((), ()))
    m12 = lax.dot_general(nv1, nv2, nt,
                          preferred_element_type=jnp.float32, precision=_HIGH)
    m21 = lax.dot_general(nv2, nv1, nt,
                          preferred_element_type=jnp.float32, precision=_HIGH)
    A = jnp.maximum(jnp.tanh(ALPHA * (m12 - m21)), 0.0)         # relu(tanh(alpha*a))

    # ---- top-k mask per row (torch: A.topk(k, 1) + scatter ones) ------------
    # K unrolled, fully vectorized select steps; lowest column index wins ties
    # (ties only occur among exact zeros, where the masked product is 0 anyway).
    # A >= 0, so -1.0 is a safe finite "already selected" marker.
    col_i = lax.broadcasted_iota(jnp.int32, (n, n), 1)
    remaining = A
    sel = jnp.zeros((n, n), dtype=jnp.bool_)
    for _ in range(K):
        row_max = jnp.max(remaining, axis=1, keepdims=True)     # (n, 1)
        is_max = remaining >= row_max
        cand = jnp.where(is_max, col_i, n)
        pick_col = jnp.min(cand, axis=1, keepdims=True)         # (n, 1)
        pick = col_i == pick_col
        sel = jnp.logical_or(sel, pick)
        remaining = jnp.where(pick, -1.0, remaining)

    # single lane-dense store of the whole output
    o_ref[...] = jnp.where(sel, A, 0.0)


def graph_constructor_pallas(idx_col, emb_cat, w_blk, b_row):
    n = idx_col.shape[0]
    vmem = lambda: pl.BlockSpec(memory_space=pltpu.MemorySpace.VMEM)
    return pl.pallas_call(
        _graph_constructor_kernel,
        out_shape=jax.ShapeDtypeStruct((n, n), jnp.float32),
        in_specs=[vmem(), vmem(), vmem(), vmem()],
        out_specs=vmem(),
    )(idx_col, emb_cat, w_blk, b_row)


# ---------------------------------------------------------------------------
# One-time parameter packing (hoisted out of the per-forward path).
#   emb_cat : [embedding1 | embedding2]                  (nnodes, 2*dim)
#   w_blk   : block-diag(W1.T, W2.T)                     (2*dim, 2*dim)
#   b_row   : [b1 | b2]                                  (1, 2*dim)
# ---------------------------------------------------------------------------
def pack_inputs(idx, p):
    d = p['w1'].shape[0]
    emb_cat = jnp.concatenate([p['emb1'], p['emb2']], axis=1)
    w_blk = jnp.zeros((2 * d, 2 * d), jnp.float32)
    w_blk = w_blk.at[:d, :d].set(p['w1'].T)
    w_blk = w_blk.at[d:, d:].set(p['w2'].T)
    b_row = jnp.concatenate([p['b1'], p['b2']]).reshape(1, 2 * d)
    idx_col = idx.astype(jnp.int32).reshape(-1, 1)
    return idx_col, emb_cat, w_blk, b_row


# ---------------------------------------------------------------------------
# Pure-JAX reference (mirrors the torch module semantics exactly).
# ---------------------------------------------------------------------------
def graph_constructor_ref(idx, p):
    nv1 = p['emb1'][idx]
    nv2 = p['emb2'][idx]
    nv1 = jnp.tanh(ALPHA * (jnp.dot(nv1, p['w1'].T, precision=_HIGH) + p['b1']))
    nv2 = jnp.tanh(ALPHA * (jnp.dot(nv2, p['w2'].T, precision=_HIGH) + p['b2']))
    a = (jnp.dot(nv1, nv2.T, precision=_HIGH)
         - jnp.dot(nv2, nv1.T, precision=_HIGH))
    A = jax.nn.relu(jnp.tanh(ALPHA * a))
    _, t1 = lax.top_k(A, K)
    n = A.shape[0]
    mask = jnp.zeros_like(A).at[jnp.arange(n)[:, None], t1].set(1.0)
    return A * mask


# ---------------------------------------------------------------------------
if __name__ == "__main__":
    key = jax.random.PRNGKey(0)
    ks = jax.random.split(key, 8)

    def u(k, shape, scale):
        return jax.random.uniform(k, shape, jnp.float32, -scale, scale)

    params = dict(
        emb1=u(ks[0], (NNODES, DIM), 0.5),
        emb2=u(ks[1], (NNODES, DIM), 0.5),
        w1=u(ks[2], (DIM, DIM), 0.2), b1=u(ks[3], (DIM,), 0.2),
        w2=u(ks[4], (DIM, DIM), 0.2), b2=u(ks[5], (DIM,), 0.2),
    )
    idx = jax.random.permutation(ks[6], NNODES).astype(jnp.int32)

    # pack once, outside the jitted forward
    idx_col, emb_cat, w_blk, b_row = pack_inputs(idx, params)

    fwd = jax.jit(graph_constructor_pallas)
    A = fwd(idx_col, emb_cat, w_blk, b_row)
    jax.block_until_ready(A)

    A_ref = graph_constructor_ref(idx, params)
    err = float(jnp.max(jnp.abs(A - A_ref)))
    assert A.shape == (NNODES, NNODES)
    assert err < 1e-3, err
    print("KERNEL_OK")
</pallas_src>

<mosaic_0001>
module attributes {stable_mosaic.version = 11 : i64} {
  func.func @_graph_constructor_kernel(%arg0: memref<16x1xi32, #tpu.memory_space<vmem>>, %arg1: memref<16x128xf32, #tpu.memory_space<vmem>>, %arg2: memref<128x128xf32, #tpu.memory_space<vmem>>, %arg3: memref<1x128xf32, #tpu.memory_space<vmem>>, %arg4: memref<16x16xf32, #tpu.memory_space<vmem>>) attributes {dimension_semantics = [], scalar_prefetch = 0 : i64, scratch_operands = 0 : i64, tpu.core_type = #tpu.core_type<tc>} {
    %c0 = arith.constant 0 : index
    %c0_0 = arith.constant 0 : index
    %0 = vector.load %arg0[%c0, %c0_0] : memref<16x1xi32, #tpu.memory_space<vmem>>, vector<16x1xi32>
    %1 = tpu.iota {dimensions = array<i32: 1>} : vector<16x16xi32>
    %2 = vector.broadcast %0 : vector<16x1xi32> to vector<16x16xi32>
    %3 = arith.cmpi eq, %1, %2 : vector<16x16xi32>
    %4 = arith.extui %3 : vector<16x16xi1> to vector<16x16xi32>
    %5 = arith.sitofp %4 : vector<16x16xi32> to vector<16x16xf32>
    %c0_1 = arith.constant 0 : index
    %c0_2 = arith.constant 0 : index
    %6 = vector.load %arg1[%c0_1, %c0_2] : memref<16x128xf32, #tpu.memory_space<vmem>>, vector<16x128xf32>
    %cst = arith.constant dense<0.000000e+00> : vector<16x128xf32>
    %7 = tpu.matmul %5, %6, %cst {dimension_numbers = #tpu.dot_dimension_numbers<[1], [0], [0], [1], [0, 0, 1, 1], [], []>, precision = #tpu.contract_precision<fp32>} : vector<16x16xf32>, vector<16x128xf32>, vector<16x128xf32> -> vector<16x128xf32>
    %c0_3 = arith.constant 0 : index
    %c0_4 = arith.constant 0 : index
    %8 = vector.load %arg2[%c0_3, %c0_4] : memref<128x128xf32, #tpu.memory_space<vmem>>, vector<128x128xf32>
    %cst_5 = arith.constant dense<0.000000e+00> : vector<16x128xf32>
    %9 = tpu.matmul %7, %8, %cst_5 {dimension_numbers = #tpu.dot_dimension_numbers<[1], [0], [0], [1], [0, 0, 1, 1], [], []>, precision = #tpu.contract_precision<fp32>} : vector<16x128xf32>, vector<128x128xf32>, vector<16x128xf32> -> vector<16x128xf32>
    %c0_6 = arith.constant 0 : index
    %c0_7 = arith.constant 0 : index
    %10 = vector.load %arg3[%c0_6, %c0_7] : memref<1x128xf32, #tpu.memory_space<vmem>>, vector<1x128xf32>
    %11 = vector.broadcast %10 : vector<1x128xf32> to vector<16x128xf32>
    %12 = arith.addf %9, %11 : vector<16x128xf32>
    %cst_8 = arith.constant 5.000000e-01 : f32
    %13 = vector.broadcast %cst_8 : f32 to vector<16x128xf32>
    %14 = arith.mulf %13, %12 : vector<16x128xf32>
    %15 = math.tanh %14 : vector<16x128xf32>
    %16 = vector.extract_strided_slice %15 {offsets = [0, 0], sizes = [16, 64], strides = [1, 1]} : vector<16x128xf32> to vector<16x64xf32>
    %17 = vector.extract_strided_slice %15 {offsets = [0, 64], sizes = [16, 64], strides = [1, 1]} : vector<16x128xf32> to vector<16x64xf32>
    %cst_9 = arith.constant dense<0.000000e+00> : vector<16x16xf32>
    %18 = tpu.matmul %16, %17, %cst_9 {dimension_numbers = #tpu.dot_dimension_numbers<[1], [1], [0], [0], [0, 0, 1, 0], [], []>, precision = #tpu.contract_precision<fp32>} : vector<16x64xf32>, vector<16x64xf32>, vector<16x16xf32> -> vector<16x16xf32>
    %cst_10 = arith.constant dense<0.000000e+00> : vector<16x16xf32>
    %19 = tpu.matmul %17, %16, %cst_10 {dimension_numbers = #tpu.dot_dimension_numbers<[1], [1], [0], [0], [0, 0, 1, 0], [], []>, precision = #tpu.contract_precision<fp32>} : vector<16x64xf32>, vector<16x64xf32>, vector<16x16xf32> -> vector<16x16xf32>
    %20 = arith.subf %18, %19 : vector<16x16xf32>
    %cst_11 = arith.constant 5.000000e-01 : f32
    %21 = vector.broadcast %cst_11 : f32 to vector<16x16xf32>
    %22 = arith.mulf %21, %20 : vector<16x16xf32>
    %23 = math.tanh %22 : vector<16x16xf32>
    %cst_12 = arith.constant 0.000000e+00 : f32
    %24 = vector.broadcast %cst_12 : f32 to vector<16x16xf32>
    %25 = arith.maximumf %23, %24 : vector<16x16xf32>
    %26 = tpu.iota {dimensions = array<i32: 1>} : vector<16x16xi32>
    %false = arith.constant false
    %27 = vector.broadcast %false : i1 to vector<16x16xi1>
    %cst_13 = arith.constant dense<0xFF800000> : vector<16xf32>
    %28 = vector.multi_reduction <maximumf>, %25, %cst_13 [1] : vector<16x16xf32> to vector<16xf32>
    %29 = vector.shape_cast %28 : vector<16xf32> to vector<16x1xf32>
    %30 = vector.broadcast %29 : vector<16x1xf32> to vector<16x16xf32>
    %31 = arith.cmpf oge, %25, %30 : vector<16x16xf32>
    %c16_i32 = arith.constant 16 : i32
    %32 = vector.broadcast %c16_i32 : i32 to vector<16x16xi32>
    %33 = arith.select %31, %26, %32 : vector<16x16xi1>, vector<16x16xi32>
    %cst_14 = arith.constant dense<2147483647> : vector<16xi32>
    %34 = vector.multi_reduction <minsi>, %33, %cst_14 [1] : vector<16x16xi32> to vector<16xi32>
    %35 = vector.shape_cast %34 : vector<16xi32> to vector<16x1xi32>
    %36 = vector.broadcast %35 : vector<16x1xi32> to vector<16x16xi32>
    %37 = arith.cmpi eq, %26, %36 : vector<16x16xi32>
    %38 = arith.ori %27, %37 : vector<16x16xi1>
    %cst_15 = arith.constant -1.000000e+00 : f32
    %39 = vector.broadcast %cst_15 : f32 to vector<16x16xf32>
    %40 = arith.select %37, %39, %25 : vector<16x16xi1>, vector<16x16xf32>
    %cst_16 = arith.constant dense<0xFF800000> : vector<16xf32>
    %41 = vector.multi_reduction <maximumf>, %40, %cst_16 [1] : vector<16x16xf32> to vector<16xf32>
    %42 = vector.shape_cast %41 : vector<16xf32> to vector<16x1xf32>
    %43 = vector.broadcast %42 : vector<16x1xf32> to vector<16x16xf32>
    %44 = arith.cmpf oge, %40, %43 : vector<16x16xf32>
    %c16_i32_17 = arith.constant 16 : i32
    %45 = vector.broadcast %c16_i32_17 : i32 to vector<16x16xi32>
    %46 = arith.select %44, %26, %45 : vector<16x16xi1>, vector<16x16xi32>
    %cst_18 = arith.constant dense<2147483647> : vector<16xi32>
    %47 = vector.multi_reduction <minsi>, %46, %cst_18 [1] : vector<16x16xi32> to vector<16xi32>
    %48 = vector.shape_cast %47 : vector<16xi32> to vector<16x1xi32>
    %49 = vector.broadcast %48 : vector<16x1xi32> to vector<16x16xi32>
    %50 = arith.cmpi eq, %26, %49 : vector<16x16xi32>
    %51 = arith.ori %38, %50 : vector<16x16xi1>
    %cst_19 = arith.constant -1.000000e+00 : f32
    %52 = vector.broadcast %cst_19 : f32 to vector<16x16xf32>
    %53 = arith.select %50, %52, %40 : vector<16x16xi1>, vector<16x16xf32>
    %cst_20 = arith.constant dense<0xFF800000> : vector<16xf32>
    %54 = vector.multi_reduction <maximumf>, %53, %cst_20 [1] : vector<16x16xf32> to vector<16xf32>
    %55 = vector.shape_cast %54 : vector<16xf32> to vector<16x1xf32>
    %56 = vector.broadcast %55 : vector<16x1xf32> to vector<16x16xf32>
    %57 = arith.cmpf oge, %53, %56 : vector<16x16xf32>
    %c16_i32_21 = arith.constant 16 : i32
    %58 = vector.broadcast %c16_i32_21 : i32 to vector<16x16xi32>
    %59 = arith.select %57, %26, %58 : vector<16x16xi1>, vector<16x16xi32>
    %cst_22 = arith.constant dense<2147483647> : vector<16xi32>
    %60 = vector.multi_reduction <minsi>, %59, %cst_22 [1] : vector<16x16xi32> to vector<16xi32>
    %61 = vector.shape_cast %60 : vector<16xi32> to vector<16x1xi32>
    %62 = vector.broadcast %61 : vector<16x1xi32> to vector<16x16xi32>
    %63 = arith.cmpi eq, %26, %62 : vector<16x16xi32>
    %64 = arith.ori %51, %63 : vector<16x16xi1>
    %cst_23 = arith.constant -1.000000e+00 : f32
    %65 = vector.broadcast %cst_23 : f32 to vector<16x16xf32>
    %66 = arith.select %63, %65, %53 : vector<16x16xi1>, vector<16x16xf32>
    %cst_24 = arith.constant dense<0xFF800000> : vector<16xf32>
    %67 = vector.multi_reduction <maximumf>, %66, %cst_24 [1] : vector<16x16xf32> to vector<16xf32>
    %68 = vector.shape_cast %67 : vector<16xf32> to vector<16x1xf32>
    %69 = vector.broadcast %68 : vector<16x1xf32> to vector<16x16xf32>
    %70 = arith.cmpf oge, %66, %69 : vector<16x16xf32>
    %c16_i32_25 = arith.constant 16 : i32
    %71 = vector.broadcast %c16_i32_25 : i32 to vector<16x16xi32>
    %72 = arith.select %70, %26, %71 : vector<16x16xi1>, vector<16x16xi32>
    %cst_26 = arith.constant dense<2147483647> : vector<16xi32>
    %73 = vector.multi_reduction <minsi>, %72, %cst_26 [1] : vector<16x16xi32> to vector<16xi32>
    %74 = vector.shape_cast %73 : vector<16xi32> to vector<16x1xi32>
    %75 = vector.broadcast %74 : vector<16x1xi32> to vector<16x16xi32>
    %76 = arith.cmpi eq, %26, %75 : vector<16x16xi32>
    %77 = arith.ori %64, %76 : vector<16x16xi1>
    %cst_27 = arith.constant -1.000000e+00 : f32
    %78 = vector.broadcast %cst_27 : f32 to vector<16x16xf32>
    %79 = arith.select %76, %78, %66 : vector<16x16xi1>, vector<16x16xf32>
    %cst_28 = arith.constant dense<0xFF800000> : vector<16xf32>
    %80 = vector.multi_reduction <maximumf>, %79, %cst_28 [1] : vector<16x16xf32> to vector<16xf32>
    %81 = vector.shape_cast %80 : vector<16xf32> to vector<16x1xf32>
    %82 = vector.broadcast %81 : vector<16x1xf32> to vector<16x16xf32>
    %83 = arith.cmpf oge, %79, %82 : vector<16x16xf32>
    %c16_i32_29 = arith.constant 16 : i32
    %84 = vector.broadcast %c16_i32_29 : i32 to vector<16x16xi32>
    %85 = arith.select %83, %26, %84 : vector<16x16xi1>, vector<16x16xi32>
    %cst_30 = arith.constant dense<2147483647> : vector<16xi32>
    %86 = vector.multi_reduction <minsi>, %85, %cst_30 [1] : vector<16x16xi32> to vector<16xi32>
    %87 = vector.shape_cast %86 : vector<16xi32> to vector<16x1xi32>
    %88 = vector.broadcast %87 : vector<16x1xi32> to vector<16x16xi32>
    %89 = arith.cmpi eq, %26, %88 : vector<16x16xi32>
    %90 = arith.ori %77, %89 : vector<16x16xi1>
    %cst_31 = arith.constant 0.000000e+00 : f32
    %91 = vector.broadcast %cst_31 : f32 to vector<16x16xf32>
    %92 = arith.select %90, %25, %91 : vector<16x16xi1>, vector<16x16xf32>
    %c0_32 = arith.constant 0 : index
    %c0_33 = arith.constant 0 : index
    %93 = vector.load %arg4[%c0_32, %c0_33] : memref<16x16xf32, #tpu.memory_space<vmem>>, vector<16x16xf32>
    tpu.vector_store %arg4[%c0_32, %c0_33], %92 {strides = array<i32>} : memref<16x16xf32, #tpu.memory_space<vmem>>, vector<16x16xf32>,
    return
  }
}

</mosaic_0001>

<bundles_post_ra>
// kernel: graph_constructor_pallas.1
= control target key start
LH: loop header
LB: loop body
LE: loop exit
PB: predicated region body
PF: predicated region fallthrough
CT: control target
= control target key end

     0   :  { %9 = vsyncpa [#allocation3], 0  ;;  %s1790_s0 = inlined_call_operand.vmem [shape: s32[16,1], index: 0, kind: input, shape index: {}]   ;;  %s1791_s1 = inlined_call_operand.vmem [shape: f32[16,128], index: 1, kind: input, shape index: {}]   ;;  %s1792_s2 = inlined_call_operand.hbm [shape: f32[128,128], index: 2, kind: input, shape index: {}]   ;;  %s1793_s3 = inlined_call_operand.vmem [shape: f32[1,128], index: 3, kind: input, shape index: {}]   ;;  %s1794_s4 = inlined_call_operand.hbm [shape: f32[16,16], index: 4, kind: output, shape index: {}]  }
   0x1   :  { %10 = vsyncpa [#allocation4], 0  ;;  %s19_s17 = sshll.u32 %s1792_s2, 4  ;;  %s1378_s18 = smov [#allocation2]   ;;  %s20_s17 = int_to_ptr.hbm [resolvable:$true] %s19_s17 }
   0x2   :  { %s21_s19 = sshll.u32 %s1378_s18, 4  ;;  %s1379_s20 = smov 128   ;;  %s22_s19 = int_to_ptr.vmem [resolvable:$true] %s21_s19 }
   0x3   :  { %s1380_s21 = smov 8  }
   0x4   :  { %27 = dma.hbm_to_vmem [thread:$0]  %s20_s17, 2048, %s22_s19, [#allocation3], %s1379_s20, %s1379_s20, %s1380_s21  }
   0x5   :  { %1374 = dma.done.wait [#allocation3], 2048  }
   0x6   :  { %1375 = vsyncadd [#allocation3], 4294965248  ;;  %v1381_v0 = vmov 0   ;;  %v35_v1 = vld [vmem:[%s1790_s0 + $0x8] sm:$0xff]  ;;  %v34_v6 = vld [vmem:[%s1790_s0] sm:$0xff]  ;;  %v36_v15 = vlaneseq  ;;  %vm52_vm0 = vcmask 130048  }
   0x7   :  { %1316 = vset.pattern.permute.xlu0 %v1381_v0  ;;  %v51_v2 = vld [vmem:[%s1791_s1 + $0x8] sm:$0xff]  ;;  %v50_v9 = vld [vmem:[%s1791_s1] sm:$0xff]  ;;  %v1382_v18 = vmov 0.0   ;;  %v264_v22 = vld [vmem:[#allocation2 + $0x78] sm:$0xff]  ;;  %vm651_vm3 = vcmask 523264   ;;  %s1384_s29 = smov [#allocation5]  }
   0x8   :  { %42 = vperm.xlu0 %1316, %v35_v1   ;;  %v73_v3 = vand.u32 4294901760, %v51_v2  ;;  %v75_v10 = vand.u32 4294901760, %v50_v9  ;;  %v1428_v16 = vand.u32 127, %v36_v15  ;;  %v263_v23 = vld [vmem:[#allocation2 + $0x70] sm:$0xff]  ;;  %v262_v24 = vld [vmem:[#allocation2 + $0x68] sm:$0xff]  ;;  %v1439_v25 = vand.u32 4294901760, %v264_v22 }
   0x9   :  { %v1441_v26 = vand.u32 4294901760, %v263_v23  ;;  %v1443_v27 = vand.u32 4294901760, %v262_v24  ;;  %v261_v28 = vld [vmem:[#allocation2 + $0x60] sm:$0xff]  ;;  %v260_v29 = vld [vmem:[#allocation2 + $0x58] sm:$0xff]  ;;  %v259_v30 = vld [vmem:[#allocation2 + $0x50] sm:$0xff]  ;;  %s1282_s30 = sshll.u32 %s1384_s29, 4  ;;  %s1283_s30 = int_to_ptr.vmem [resolvable:$true] %s1282_s30 }
   0xa   :  { %v109_v4 = vsub.f32 %v51_v2, %v73_v3  ;;  %1305 = vmatpush.msra.mxu2 %v73_v3  ;;  %74 = vmatpush.msra.mxu0 %v73_v3  ;;  %v115_v11 = vsub.f32 %v50_v9, %v75_v10  ;;  %v1446_v32 = vand.u32 4294901760, %v261_v28  ;;  %v1448_v33 = vand.u32 4294901760, %v260_v29  ;;  %v258_v35 = vld [vmem:[#allocation2 + $0x48] sm:$0xff]  ;;  %v257_v58 = vld [vmem:[#allocation2 + $0x40] sm:$0xff]  ;;  %v256_v59 = vld [vmem:[#allocation2 + $0x38] sm:$0xff]  ;;  %s1284_s7 = sshll.u32 %s1794_s4, 4  ;;  %s1285_s7 = int_to_ptr.hbm [resolvable:$true] %s1284_s7 }
   0xb   :  { %v1450_v34 = vand.u32 4294901760, %v259_v30  ;;  %v1453_v36 = vsub.f32 %v264_v22, %v1439_v25  ;;  %v1456_v37 = vsub.f32 %v263_v23, %v1441_v26  ;;  %v1459_v38 = vsub.f32 %v262_v24, %v1443_v27 }
   0xc   :  { %v110_v5 = vand.u32 4294901760, %v109_v4  ;;  %1306 = vmatpush.msra.mxu2 %v75_v10  ;;  %76 = vmatpush.msra.mxu0 %v75_v10  ;;  %v116_v12 = vand.u32 4294901760, %v115_v11  ;;  %v1461_v39 = vand.u32 4294901760, %v258_v35  ;;  %v1467_v42 = vsub.f32 %v261_v28, %v1446_v32 }
   0xd   :  { %v1470_v43 = vsub.f32 %v260_v29, %v1448_v33  ;;  %v1473_v44 = vsub.f32 %v259_v30, %v1450_v34  ;;  %v320_v45 = vand.u32 4294901760, %v1453_v36  ;;  %v326_v46 = vand.u32 4294901760, %v1456_v37  ;;  %v254_v29 = vld [vmem:[#allocation2 + $0x28] sm:$0xff] }
   0xe   :  { %v111_v7 = vsub.f32 %v109_v4, %v110_v5  ;;  %145 = vmatpush.msrb.mxu2 %v109_v4  ;;  %208 = vmatpush.msrb.mxu0 %v110_v5  ;;  %v117_v13 = vsub.f32 %v115_v11, %v116_v12  ;;  %v332_v47 = vand.u32 4294901760, %v1459_v38  ;;  %v338_v50 = vand.u32 4294901760, %v1467_v42 }
   0xf   :  { %v344_v51 = vand.u32 4294901760, %v1470_v43  ;;  %v321_v53 = vsub.f32 %v1453_v36, %v320_v45  ;;  %v327_v54 = vsub.f32 %v1456_v37, %v326_v46  ;;  %v350_v62 = vand.u32 4294901760, %v1473_v44 }
  0x10   :  { %39 = vperm.xlu0 %1316, %v34_v6   ;;  %v112_v8 = vand.u32 4294901760, %v111_v7  ;;  %148 = vmatpush.msrb.mxu2 %v115_v11  ;;  %v118_v14 = vand.u32 4294901760, %v117_v13  ;;  %v333_v55 = vsub.f32 %v1459_v38, %v332_v47  ;;  %v339_v57 = vsub.f32 %v1467_v42, %v338_v50 }
  0x11   :  { %212 = vmatpush.msrb.mxu0 %v116_v12  ;;  %v322_v60 = vand.u32 4294901760, %v321_v53  ;;  %v328_v61 = vand.u32 4294901760, %v327_v54  ;;  %v1503_v63 = vsub.f32 %v258_v35, %v1461_v39  ;;  %v345_v1 = vsub.f32 %v1470_v43, %v344_v51 }
  0x12   :  { %1307 = vmatpush.msra.mxu3 %v112_v8  ;;  %113 = vmatpush.msra.mxu1 %v112_v8  ;;  %v334_v2 = vand.u32 4294901760, %v333_v55  ;;  %v1511_v4 = vand.u32 4294901760, %v257_v58  ;;  %v1513_v5 = vand.u32 4294901760, %v256_v59  ;;  %v340_v7 = vand.u32 4294901760, %v339_v57  ;;  %v251_v55 = vld [vmem:[#allocation2 + $0x10] sm:$0xff] }
  0x13   :  { %v351_v8 = vsub.f32 %v1473_v44, %v350_v62  ;;  %v346_v12 = vand.u32 4294901760, %v345_v1 }
  0x14   :  { %1308 = vmatpush.msra.mxu3 %v118_v14  ;;  %119 = vmatpush.msra.mxu1 %v118_v14  ;;  %v1521_v9 = vsub.f32 %v257_v58, %v1511_v4 }
  0x16   :  { %175 = vmatpush.msrb.mxu3 %v73_v3  ;;  %237 = vmatpush.msrb.mxu1 %v73_v3  ;;  %v356_v3 = vand.u32 4294901760, %v1503_v63  ;;  %v362_v14 = vand.u32 4294901760, %v1521_v9 }
  0x18   :  { %177 = vmatpush.msrb.mxu3 %v75_v10  ;;  %239 = vmatpush.msrb.mxu1 %v75_v10  ;;  %v1524_v10 = vsub.f32 %v256_v59, %v1513_v5  ;;  %v357_v13 = vsub.f32 %v1503_v63, %v356_v3 }
  0x1a   :  { %v368_v15 = vand.u32 4294901760, %v1524_v10 }
  0x1c   :  { %v369_v22 = vsub.f32 %v1524_v10, %v368_v15 }
  0x1e   :  { %v370_v24 = vand.u32 4294901760, %v369_v22 }
  0x7a   :  { %v43_v17 = vpop.permute.xlu0 %42 }
  0x7b   :  { %vm45_vm1 = vcmp.eq.s32.totalorder %v1428_v16, %v43_v17  ;;  %v352_v17 = vand.u32 4294901760, %v351_v8  ;;  %v249_v8 = vld [vmem:[#allocation2] sm:$0xff] }
  0x7c   :  { %v1431_v19 = vsel %vm45_vm1, 1.0, %v1382_v18 }
  0x7d   :  { %v57_v20 = vsel %vm52_vm0, %v1431_v19, 0  ;;  %1300 = vmatmul.msk.f32.vlgmr.msra.gmra.mxu3 %vm52_vm0, %v1431_v19 }
  0x7e   :  { %v1437_v21 = vsub.f32 %v57_v20, %v57_v20  ;;  %323 = vmatpush.msra.mxu3 %v322_v60  ;;  %v358_v20 = vand.u32 4294901760, %v357_v13  ;;  %v1608_v60 = vand.u32 4294901760, %v251_v55 }
  0x80   :  { %v87_v31 = vand.u32 4294901760, %v1437_v21  ;;  %329 = vmatpush.msra.mxu3 %v328_v61  ;;  %v250_v61 = vld [vmem:[#allocation2 + $0x8] sm:$0xff] }
  0x82   :  { %v40_v40 = vpop.permute.xlu0 %39  ;;  %v88_v41 = vsub.f32 %v1437_v21, %v87_v31  ;;  %335 = vmatpush.msra.mxu3 %v334_v2 }
  0x83   :  { %vm44_vm2 = vcmp.eq.s32.totalorder %v1428_v16, %v40_v40 }
  0x84   :  { %v1479_v48 = vsel %vm44_vm2, 1.0, %v1382_v18  ;;  %v89_v49 = vand.u32 4294901760, %v88_v41  ;;  %341 = vmatpush.msra.mxu3 %v340_v7  ;;  %v363_v18 = vsub.f32 %v1521_v9, %v362_v14  ;;  %v397_v7 = vsub.f32 %v251_v55, %v1608_v60 }
  0x85   :  { %v54_v52 = vsel %vm52_vm0, %v1479_v48, 0  ;;  %1299 = vmatmul.msk.f32.vlgmr.msra.gmra.mxu1 %vm52_vm0, %v1479_v48 }
  0x86   :  { %v78_v56 = vsub.f32 %v54_v52, %v54_v52  ;;  %90 = vmatmul.f32.vlgmr.msra.gmra.mxu2 %v89_v49  ;;  %483 = vmatpush.msra.mxu1 %v1439_v25  ;;  %v364_v23 = vand.u32 4294901760, %v363_v18  ;;  %v398_v18 = vand.u32 4294901760, %v397_v7 }
  0x87   :  { %270 = vmatpush.msra.mxu2 %v1439_v25  ;;  %347 = vmatpush.msra.mxu3 %v346_v12 }
  0x88   :  { %v79_v0 = vand.u32 4294901760, %v78_v56  ;;  %485 = vmatpush.msra.mxu1 %v1441_v26 }
  0x89   :  { %272 = vmatpush.msra.mxu2 %v1441_v26  ;;  %353 = vmatpush.msra.mxu3 %v352_v17  ;;  %v299_v17 = vand.u32 4294901760, %v249_v8 }
  0x8a   :  { %181 = vmatmul.f32.vlgmr.msrb.gmra.mxu3 %v79_v0  ;;  %v80_v6 = vsub.f32 %v78_v56, %v79_v0  ;;  %487 = vmatpush.msra.mxu1 %v1443_v27 }
  0x8b   :  { %274 = vmatpush.msra.mxu2 %v1443_v27  ;;  %359 = vmatpush.msra.mxu3 %v358_v20 }
  0x8c   :  { %v81_v11 = vand.u32 4294901760, %v80_v6  ;;  %489 = vmatpush.msra.mxu1 %v1446_v32  ;;  %v1615_v6 = vand.u32 4294901760, %v250_v61 }
  0x8d   :  { %1303 = vmatmul.msk.f32.vlgmr.msrb.gmra.mxu1 %vm52_vm0, %v1479_v48  ;;  %276 = vmatpush.msra.mxu2 %v1446_v32 }
  0x8e   :  { %82 = vmatmul.f32.vlgmr.msra.gmra.mxu0 %v81_v11  ;;  %151 = vmatmul.f32.vlgmr.msrb.gmra.mxu2 %v78_v56  ;;  %v403_v13 = vsub.f32 %v250_v61, %v1615_v6 }
  0x8f   :  { %425 = vmatpush.msra.mxu0 %v1453_v36  ;;  %491 = vmatpush.msra.mxu1 %v1448_v33 }
  0x90   :  { %278 = vmatpush.msra.mxu2 %v1448_v33  ;;  %365 = vmatpush.msra.mxu3 %v364_v23  ;;  %v404_v22 = vand.u32 4294901760, %v403_v13  ;;  %v409_v23 = vsub.f32 %v249_v8, %v299_v17 }
  0x91   :  { %428 = vmatpush.msra.mxu0 %v1456_v37  ;;  %493 = vmatpush.msra.mxu1 %v1450_v34 }
  0x92   :  { %187 = vmatmul.f32.gmra.mxu3 %v87_v31  ;;  %280 = vmatpush.msra.mxu2 %v1450_v34  ;;  %v1574_v31 = vand.u32 4294901760, %v254_v29 }
  0x93   :  { %431 = vmatpush.msra.mxu0 %v1459_v38  ;;  %495 = vmatpush.msra.mxu1 %v1461_v39 }
  0x94   :  { %282 = vmatpush.msra.mxu2 %v1461_v39  ;;  %371 = vmatpush.msra.mxu3 %v370_v24  ;;  %v1580_v40 = vsub.f32 %v254_v29, %v1574_v31  ;;  %v399_v24 = vsub.f32 %v397_v7, %v398_v18  ;;  %v410_v29 = vand.u32 4294901760, %v409_v23 }
  0x95   :  { %1304 = vmatmul.msk.f32.gmra.mxu1 %vm52_vm0, %v1431_v19  ;;  %434 = vmatpush.msra.mxu0 %v1467_v42 }
  0x96   :  { %156 = vmatmul.f32.gmra.mxu2 %v1437_v21  ;;  %1301 = vmatmul.msk.f32.vlgmr.msrb.gmra.mxu0 %vm52_vm0, %v1479_v48  ;;  %v255_v21 = vld [vmem:[#allocation2 + $0x30] sm:$0xff]  ;;  %v252_v48 = vld [vmem:[#allocation2 + $0x18] sm:$0xff]  ;;  %v380_v52 = vand.u32 4294901760, %v1580_v40 }
  0x97   :  { %284 = vmatpush.msra.mxu2 %v1511_v4  ;;  %437 = vmatpush.msra.mxu0 %v1470_v43  ;;  %v1569_v28 = vand.u32 4294901760, %v255_v21  ;;  %v1594_v54 = vand.u32 4294901760, %v252_v48 }
  0x98   :  { %497 = vmatpush.msra.mxu1 %v1511_v4  ;;  %v381_v57 = vsub.f32 %v1580_v40, %v380_v52 }
  0x99   :  { %286 = vmatpush.msra.mxu2 %v1513_v5  ;;  %440 = vmatpush.msra.mxu0 %v1473_v44  ;;  %v1572_v30 = vsub.f32 %v255_v21, %v1569_v28  ;;  %v1604_v59 = vsub.f32 %v252_v48, %v1594_v54  ;;  %v405_v21 = vsub.f32 %v403_v13, %v404_v22 }
  0x9a   :  { %499 = vmatpush.msra.mxu1 %v1513_v5  ;;  %v382_v0 = vand.u32 4294901760, %v381_v57  ;;  %v1317_v57 = vld [vmem:[%s1793_s3] ss:$0 sm:$0xff]  ;;  %s1383_s3 = smov 64  }
  0x9b   :  { %443 = vmatpush.msra.mxu0 %v1503_v63  ;;  %288 = vmatpush.msra.mxu2 %v1569_v28  ;;  %v374_v35 = vand.u32 4294901760, %v1572_v30  ;;  %v392_v2 = vand.u32 4294901760, %v1604_v59  ;;  %v406_v48 = vand.u32 4294901760, %v405_v21 }
  0x9c   :  { %501 = vmatpush.msra.mxu1 %v1569_v28 }
  0x9d   :  { %446 = vmatpush.msra.mxu0 %v1521_v9  ;;  %290 = vmatpush.msra.mxu2 %v1574_v31  ;;  %v375_v49 = vsub.f32 %v1572_v30, %v374_v35  ;;  %v393_v12 = vsub.f32 %v1604_v59, %v392_v2 }
  0x9e   :  { %1302 = vmatmul.msk.f32.gmra.mxu0 %vm52_vm0, %v1431_v19  ;;  %v253_v19 = vld [vmem:[#allocation2 + $0x20] sm:$0xff]  ;;  %503 = vmatpush.msra.mxu1 %v1574_v31 }
  0x9f   :  { %449 = vmatpush.msra.mxu0 %v1524_v10  ;;  %v1582_v41 = vand.u32 4294901760, %v253_v19  ;;  %v376_v56 = vand.u32 4294901760, %v375_v49  ;;  %v394_v20 = vand.u32 4294901760, %v393_v12  ;;  %v411_v49 = vsub.f32 %v409_v23, %v410_v29 }
  0xa1   :  { %452 = vmatpush.msra.mxu0 %v1572_v30  ;;  %v1592_v53 = vsub.f32 %v253_v19, %v1582_v41  ;;  %292 = vmatpush.msra.mxu2 %v1582_v41  ;;  %v400_v19 = vand.u32 4294901760, %v399_v24  ;;  %v412_v55 = vand.u32 4294901760, %v411_v49 }
  0xa2   :  { %505 = vmatpush.msra.mxu1 %v1582_v41  ;;  %377 = vmatpush.msra.mxu3 %v376_v56 }
  0xa3   :  { %455 = vmatpush.msra.mxu0 %v1580_v40  ;;  %v386_v58 = vand.u32 4294901760, %v1592_v53  ;;  %294 = vmatpush.msra.mxu2 %v1594_v54 }
  0xa4   :  { %507 = vmatpush.msra.mxu1 %v1594_v54  ;;  %383 = vmatpush.msra.mxu3 %v382_v0 }
  0xa5   :  { %458 = vmatpush.msra.mxu0 %v1592_v53  ;;  %v387_v1 = vsub.f32 %v1592_v53, %v386_v58  ;;  %296 = vmatpush.msra.mxu2 %v1608_v60 }
  0xa6   :  { %509 = vmatpush.msra.mxu1 %v1608_v60 }
  0xa7   :  { %461 = vmatpush.msra.mxu0 %v1604_v59  ;;  %v388_v11 = vand.u32 4294901760, %v387_v1  ;;  %298 = vmatpush.msra.mxu2 %v1615_v6 }
  0xa8   :  { %511 = vmatpush.msra.mxu1 %v1615_v6 }
  0xa9   :  { %464 = vmatpush.msra.mxu0 %v397_v7  ;;  %389 = vmatpush.msra.mxu3 %v388_v11 }
  0xaa   :  { %300 = vmatpush.msra.mxu2 %v299_v17  ;;  %513 = vmatpush.msra.mxu1 %v299_v17 }
  0xab   :  { %467 = vmatpush.msra.mxu0 %v403_v13  ;;  %395 = vmatpush.msra.mxu3 %v394_v20 }
  0xac   :  { %530 = vmatpush.msrb.mxu2 %v320_v45 }
  0xad   :  { %470 = vmatpush.msra.mxu0 %v409_v23  ;;  %401 = vmatpush.msra.mxu3 %v400_v19 }
  0xae   :  { %534 = vmatpush.msrb.mxu2 %v326_v46 }
  0xaf   :  { %407 = vmatpush.msra.mxu3 %v406_v48 }
  0xb0   :  { %538 = vmatpush.msrb.mxu2 %v332_v47 }
  0xb1   :  { %413 = vmatpush.msra.mxu3 %v412_v55 }
  0xb2   :  { %542 = vmatpush.msrb.mxu2 %v338_v50 }
  0xb3   :  { %601 = vmatpush.msrb.mxu3 %v1439_v25 }
  0xb4   :  { %546 = vmatpush.msrb.mxu2 %v344_v51 }
  0xb5   :  { %603 = vmatpush.msrb.mxu3 %v1441_v26 }
  0xb6   :  { %550 = vmatpush.msrb.mxu2 %v350_v62 }
  0xb7   :  { %605 = vmatpush.msrb.mxu3 %v1443_v27 }
  0xb8   :  { %554 = vmatpush.msrb.mxu2 %v356_v3 }
  0xb9   :  { %607 = vmatpush.msrb.mxu3 %v1446_v32 }
  0xba   :  { %558 = vmatpush.msrb.mxu2 %v362_v14 }
  0xbb   :  { %609 = vmatpush.msrb.mxu3 %v1448_v33 }
  0xbc   :  { %562 = vmatpush.msrb.mxu2 %v368_v15 }
  0xbd   :  { %611 = vmatpush.msrb.mxu3 %v1450_v34 }
  0xbe   :  { %566 = vmatpush.msrb.mxu2 %v374_v35 }
  0xbf   :  { %613 = vmatpush.msrb.mxu3 %v1461_v39 }
  0xc0   :  { %570 = vmatpush.msrb.mxu2 %v380_v52 }
  0xc1   :  { %615 = vmatpush.msrb.mxu3 %v1511_v4 }
  0xc2   :  { %574 = vmatpush.msrb.mxu2 %v386_v58 }
  0xc3   :  { %617 = vmatpush.msrb.mxu3 %v1513_v5 }
  0xc4   :  { %578 = vmatpush.msrb.mxu2 %v392_v2 }
  0xc5   :  { %619 = vmatpush.msrb.mxu3 %v1569_v28 }
  0xc6   :  { %582 = vmatpush.msrb.mxu2 %v398_v18 }
  0xc7   :  { %621 = vmatpush.msrb.mxu3 %v1574_v31 }
  0xc8   :  { %586 = vmatpush.msrb.mxu2 %v404_v22 }
  0xc9   :  { %623 = vmatpush.msrb.mxu3 %v1582_v41 }
  0xca   :  { %590 = vmatpush.msrb.mxu2 %v410_v29 }
  0xcb   :  { %625 = vmatpush.msrb.mxu3 %v1594_v54 }
  0xcd   :  { %627 = vmatpush.msrb.mxu3 %v1608_v60 }
  0xcf   :  { %629 = vmatpush.msrb.mxu3 %v1615_v6 }
  0xd1   :  { %631 = vmatpush.msrb.mxu3 %v299_v17 }
 0x100   :  { %v126_v25 = vpop.f32.mrf.mxu3 }
 0x102   :  { %v122_v27 = vpop.f32.mrf.mxu1 }
 0x109   :  { %v91_v26 = vpop.f32.mrf.mxu2 }
 0x10a   :  { %v242_v42 = vpop.f32.mrf.mxu1  ;;  %v127_v44 = vadd.f32 %v126_v25, %v91_v26 }
 0x10b   :  { %v83_v32 = vpop.f32.mrf.mxu0 }
 0x10c   :  { %v123_v33 = vadd.f32 %v122_v27, %v83_v32 }
 0x10d   :  { %v182_v34 = vpop.f32.mrf.mxu3 }
 0x111   :  { %v152_v36 = vpop.f32.mrf.mxu2 }
 0x112   :  { %v153_v37 = vadd.f32 %v152_v36, %v123_v33  ;;  %v246_v9 = vpop.f32.mrf.mxu1 }
 0x113   :  { %v215_v38 = vpop.f32.mrf.mxu0 }
 0x114   :  { %v183_v39 = vadd.f32 %v182_v34, %v153_v37 }
 0x115   :  { %v188_v51 = vpop.f32.mrf.mxu3 }
 0x116   :  { %v216_v43 = vadd.f32 %v215_v38, %v183_v39 }
 0x118   :  { %v243_v45 = vadd.f32 %v242_v42, %v216_v43 }
 0x119   :  { %v157_v46 = vpop.f32.mrf.mxu2 }
 0x11a   :  { %v301_v47 = vand.u32 4294901760, %v243_v45  ;;  %v158_v50 = vadd.f32 %v157_v46, %v127_v44 }
 0x11b   :  { %v219_v3 = vpop.f32.mrf.mxu0 }
 0x11c   :  { %v302_v62 = vsub.f32 %v243_v45, %v301_v47  ;;  %v189_v63 = vadd.f32 %v188_v51, %v158_v50  ;;  %415 = vmatmul.f32.vlgmr.msra.gmra.mxu3 %v301_v47 }
 0x11e   :  { %v220_v4 = vadd.f32 %v219_v3, %v189_v63  ;;  %473 = vmatmul.f32.vlgmr.msra.gmra.mxu0 %v302_v62  ;;  %v303_v5 = vand.u32 4294901760, %v302_v62 }
 0x120   :  { %v247_v10 = vadd.f32 %v246_v9, %v220_v4  ;;  %517 = vmatmul.f32.vlgmr.msra.gmra.mxu1 %v303_v5  ;;  %v304_v14 = vsub.f32 %v302_v62, %v303_v5 }
 0x122   :  { %v309_v15 = vand.u32 4294901760, %v247_v10  ;;  %v305_v28 = vand.u32 4294901760, %v304_v14 }
 0x124   :  { %306 = vmatmul.f32.vlgmr.msra.gmra.mxu2 %v305_v28  ;;  %419 = vmatmul.f32.gmra.mxu3 %v309_v15  ;;  %v310_v30 = vsub.f32 %v247_v10, %v309_v15 }
 0x126   :  { %478 = vmatmul.f32.gmra.mxu0 %v310_v30  ;;  %v311_v31 = vand.u32 4294901760, %v310_v30 }
 0x128   :  { %523 = vmatmul.f32.gmra.mxu1 %v311_v31  ;;  %v312_v35 = vsub.f32 %v310_v30, %v311_v31 }
 0x12a   :  { %v313_v40 = vand.u32 4294901760, %v312_v35 }
 0x12c   :  { %314 = vmatmul.f32.gmra.mxu2 %v313_v40  ;;  %633 = vmatmul.f32.vlgmr.msrb.gmra.mxu3 %v301_v47 }
 0x134   :  { %592 = vmatmul.f32.vlgmr.msrb.gmra.mxu2 %v301_v47  ;;  %637 = vmatmul.f32.gmra.mxu3 %v309_v15 }
 0x13c   :  { %596 = vmatmul.f32.gmra.mxu2 %v309_v15 }
 0x19b   :  { %v474_v54 = vpop.f32.mrf.mxu0 }
 0x19d   :  { %v518_v59 = vpop.f32.mrf.mxu1 }
 0x19f   :  { %v416_v41 = vpop.f32.mrf.mxu3 }
 0x1a3   :  { %v479_v6 = vpop.f32.mrf.mxu0 }
 0x1a5   :  { %v524_v11 = vpop.f32.mrf.mxu1 }
 0x1a7   :  { %v307_v52 = vpop.f32.mrf.mxu2  ;;  %v420_v53 = vpop.f32.mrf.mxu3 }
 0x1a8   :  { %v308_v60 = vadd.f32 %v1317_v57, %v307_v52 }
 0x1aa   :  { %v417_v2 = vadd.f32 %v416_v41, %v308_v60 }
 0x1ac   :  { %v475_v8 = vadd.f32 %v474_v54, %v417_v2 }
 0x1ae   :  { %v519_v17 = vadd.f32 %v518_v59, %v475_v8 }
 0x1af   :  { %v315_v56 = vpop.f32.mrf.mxu2  ;;  %v634_v0 = vpop.f32.mrf.mxu3 }
 0x1b0   :  { %v316_v58 = vadd.f32 %v1317_v57, %v315_v56 }
 0x1b2   :  { %v421_v61 = vadd.f32 %v420_v53, %v316_v58 }
 0x1b4   :  { %v480_v7 = vadd.f32 %v479_v6, %v421_v61 }
 0x1b6   :  { %v525_v12 = vadd.f32 %v524_v11, %v480_v7 }
 0x1b7   :  { %v593_v1 = vpop.f32.mrf.mxu2  ;;  %v638_v20 = vpop.f32.mrf.mxu3 }
 0x1b8   :  { %v594_v22 = vadd.f32 %v593_v1, %v519_v17 }
 0x1ba   :  { %v635_v21 = vadd.f32 %v634_v0, %v594_v22 }
 0x1bc   :  { %v641_v29 = vmul.f32 0.5, %v635_v21 }
 0x1bf   :  { %v597_v13 = vpop.f32.mrf.mxu2 }
 0x1c0   :  { %v598_v18 = vadd.f32 %v597_v13, %v525_v12 }
 0x1c2   :  { %v639_v23 = vadd.f32 %v638_v20, %v598_v18 }
 0x1c4   :  { %v642_v24 = vmul.f32 0.5, %v639_v23 }
 0x1c6   :  { %1318 = vtanh.f32 %v642_v24 }
 0x1c7   :  { %1320 = vtanh.f32 %v641_v29 }
 0x1cc   :  { %v1319_v19 = vpop.eup %1318 }
 0x1cd   :  { %649 = vrot.lane.b32.xlu1 %v1319_v19, %s1383_s3  ;;  %v1321_v48 = vpop.eup %1320  ;;  %v654_v32 = vsel %vm651_vm3, %v1319_v19, 0 }
 0x1ce   :  { %v652_v49 = vsel %vm651_vm3, %v1321_v48, 0  ;;  %v686_v36 = vand.u32 4294901760, %v654_v32 }
 0x1cf   :  { %v678_v55 = vand.u32 4294901760, %v652_v49 }
 0x1d0   :  { %v687_v45 = vsub.f32 %v654_v32, %v686_v36 }
 0x1d1   :  { %v679_v27 = vsub.f32 %v652_v49, %v678_v55 }
 0x1d2   :  { %v688_v62 = vand.u32 4294901760, %v687_v45 }
 0x1d3   :  { %v680_v37 = vand.u32 4294901760, %v679_v27 }
 0x1d4   :  { %v689_v4 = vsub.f32 %v687_v45, %v688_v62 }
 0x1d5   :  { %647 = vrot.lane.b32.xlu1 %v1321_v48, %s1383_s3  ;;  %v681_v44 = vsub.f32 %v679_v27, %v680_v37 }
 0x1d6   :  { %v690_v9 = vand.u32 4294901760, %v689_v4 }
 0x1d7   :  { %v682_v51 = vand.u32 4294901760, %v681_v44 }
 0x23f   :  { %v650_v25 = vpop.permute.xlu1 %649 }
 0x240   :  { %v658_v26 = vsel %vm651_vm3, %v650_v25, 0 }
 0x241   :  { %v1670_v33 = vand.u32 4294901760, %v658_v26 }
 0x243   :  { %v710_v34 = vsub.f32 %v658_v26, %v1670_v33  ;;  %675 = vmatpush.xpose.msrb.mxu0 %v1670_v33  ;;  %838 = vmatpush.xpose.msra.mxu3 %v1670_v33 }
 0x245   :  { %v711_v38 = vand.u32 4294901760, %v710_v34 }
 0x247   :  { %809 = vmatpush.xpose.msra.mxu2 %v711_v38  ;;  %v648_v39 = vpop.permute.xlu1 %647  ;;  %v712_v42 = vsub.f32 %v710_v34, %v711_v38 }
 0x248   :  { %v656_v43 = vsel %vm651_vm3, %v648_v39, 0 }
 0x249   :  { %v676_v46 = vand.u32 4294901760, %v656_v43  ;;  %v713_v47 = vand.u32 4294901760, %v712_v42 }
 0x24b   :  { %v716_v50 = vsub.f32 %v656_v43, %v676_v46  ;;  %677 = vmatpush.xpose.msrb.mxu0 %v676_v46  ;;  %714 = vmatpush.xpose.msrb.mxu1 %v713_v47 }
 0x24c   :  { %840 = vmatpush.xpose.msra.mxu3 %v676_v46 }
 0x24d   :  { %v717_v63 = vand.u32 4294901760, %v716_v50 }
 0x24e   :  { %683 = vmatmul.f32.vlgmr.msrb.gmra.mxu0 %v682_v51 }
 0x24f   :  { %746 = vmatpush.xpose.msra.mxu0 %v710_v34  ;;  %842 = vmatmul.f32.vlgmr.msra.gmra.mxu3 %v678_v55  ;;  %v718_v3 = vsub.f32 %v716_v50, %v717_v63 }
 0x250   :  { %966 = vmatpush.xpose.msrb.mxu3 %v686_v36  ;;  %813 = vmatpush.xpose.msra.mxu2 %v717_v63 }
 0x251   :  { %v719_v5 = vand.u32 4294901760, %v718_v3 }
 0x253   :  { %749 = vmatpush.xpose.msra.mxu0 %v716_v50  ;;  %815 = vmatmul.f32.vlgmr.msra.gmra.mxu2 %v678_v55 }
 0x254   :  { %936 = vmatpush.xpose.msrb.mxu2 %v687_v45  ;;  %968 = vmatpush.xpose.msrb.mxu3 %v678_v55 }
 0x255   :  { %720 = vmatpush.xpose.msrb.mxu1 %v719_v5 }
 0x256   :  { %691 = vmatmul.f32.gmra.mxu0 %v690_v9 }
 0x257   :  { %865 = vmatpush.xpose.msrb.mxu0 %v686_v36  ;;  %846 = vmatmul.f32.gmra.mxu3 %v686_v36 }
 0x258   :  { %939 = vmatpush.xpose.msrb.mxu2 %v679_v27  ;;  %722 = vmatmul.f32.vlgmr.msrb.gmra.mxu1 %v678_v55 }
 0x259   :  { %776 = vmatpush.xpose.msra.mxu1 %v1670_v33 }
 0x25b   :  { %867 = vmatpush.xpose.msrb.mxu0 %v678_v55  ;;  %819 = vmatmul.f32.gmra.mxu2 %v686_v36 }
 0x25d   :  { %778 = vmatpush.xpose.msra.mxu1 %v676_v46 }
 0x25e   :  { %752 = vmatmul.f32.vlgmr.msra.gmra.mxu0 %v679_v27 }
 0x25f   :  { %972 = vmatmul.f32.vlgmr.msrb.gmra.mxu3 %v717_v63  ;;  %999 = vmatpush.xpose.msra.mxu0 %v688_v62 }
 0x260   :  { %726 = vmatmul.f32.gmra.mxu1 %v686_v36 }
 0x261   :  { %904 = vmatpush.xpose.msrb.mxu1 %v690_v9 }
 0x263   :  { %942 = vmatmul.f32.vlgmr.msrb.gmra.mxu2 %v716_v50  ;;  %1003 = vmatpush.xpose.msra.mxu0 %v680_v37 }
 0x265   :  { %910 = vmatpush.xpose.msrb.mxu1 %v682_v51 }
 0x266   :  { %757 = vmatmul.f32.gmra.mxu0 %v687_v45 }
 0x267   :  { %978 = vmatmul.f32.gmra.mxu3 %v711_v38 }
 0x268   :  { %782 = vmatmul.f32.vlgmr.msra.gmra.mxu1 %v680_v37 }
 0x269   :  { %1028 = vmatpush.xpose.msra.mxu1 %v686_v36 }
 0x26b   :  { %947 = vmatmul.f32.gmra.mxu2 %v710_v34 }
 0x26d   :  { %1030 = vmatpush.xpose.msra.mxu1 %v678_v55 }
 0x26e   :  { %873 = vmatmul.f32.vlgmr.msrb.gmra.mxu0 %v719_v5 }
 0x270   :  { %788 = vmatmul.f32.gmra.mxu1 %v688_v62 }
 0x276   :  { %881 = vmatmul.f32.gmra.mxu0 %v713_v47 }
 0x278   :  { %912 = vmatmul.f32.vlgmr.msrb.gmra.mxu1 %v676_v46 }
 0x27e   :  { %1005 = vmatmul.f32.vlgmr.msra.gmra.mxu0 %v676_v46 }
 0x280   :  { %916 = vmatmul.f32.gmra.mxu1 %v1670_v33 }
 0x286   :  { %1009 = vmatmul.f32.gmra.mxu0 %v1670_v33 }
 0x288   :  { %1032 = vmatmul.f32.vlgmr.msra.gmra.mxu1 %v676_v46 }
 0x290   :  { %1036 = vmatmul.f32.gmra.mxu1 %v1670_v33 }
 0x2cb   :  { %v684_v10 = vpop.f32.mrf.mxu0 }
 0x2d2   :  { %v843_v41 = vpop.f32.mrf.mxu3 }
 0x2d3   :  { %v692_v14 = vpop.f32.mrf.mxu0 }
 0x2d5   :  { %v723_v15 = vpop.f32.mrf.mxu1 }
 0x2d6   :  { %v816_v40 = vpop.f32.mrf.mxu2  ;;  %v724_v59 = vadd.f32 %v723_v15, %v684_v10 }
 0x2da   :  { %v847_v56 = vpop.f32.mrf.mxu3 }
 0x2db   :  { %v753_v30 = vpop.f32.mrf.mxu0 }
 0x2dc   :  { %v754_v0 = vadd.f32 %v753_v30, %v724_v59 }
 0x2dd   :  { %v727_v28 = vpop.f32.mrf.mxu1 }
 0x2de   :  { %v820_v54 = vpop.f32.mrf.mxu2  ;;  %v728_v11 = vadd.f32 %v727_v28, %v692_v14 }
 0x2e2   :  { %v973_v7 = vpop.f32.mrf.mxu3 }
 0x2e3   :  { %v758_v31 = vpop.f32.mrf.mxu0 }
 0x2e4   :  { %v759_v18 = vadd.f32 %v758_v31, %v728_v11 }
 0x2e5   :  { %v783_v35 = vpop.f32.mrf.mxu1 }
 0x2e6   :  { %v943_v61 = vpop.f32.mrf.mxu2  ;;  %v784_v2 = vadd.f32 %v783_v35, %v754_v0 }
 0x2e8   :  { %v817_v12 = vadd.f32 %v816_v40, %v784_v2 }
 0x2ea   :  { %v844_v29 = vadd.f32 %v843_v41, %v817_v12  ;;  %v979_v49 = vpop.f32.mrf.mxu3 }
 0x2eb   :  { %v874_v53 = vpop.f32.mrf.mxu0 }
 0x2ed   :  { %v789_v52 = vpop.f32.mrf.mxu1 }
 0x2ee   :  { %v948_v22 = vpop.f32.mrf.mxu2  ;;  %v790_v24 = vadd.f32 %v789_v52, %v759_v18 }
 0x2f0   :  { %v821_v25 = vadd.f32 %v820_v54, %v790_v24 }
 0x2f2   :  { %v848_v34 = vadd.f32 %v847_v56, %v821_v25 }
 0x2f3   :  { %v882_v57 = vpop.f32.mrf.mxu0 }
 0x2f5   :  { %v913_v58 = vpop.f32.mrf.mxu1 }
 0x2f6   :  { %v914_v60 = vadd.f32 %v913_v58, %v874_v53 }
 0x2f8   :  { %v944_v6 = vadd.f32 %v943_v61, %v914_v60 }
 0x2fa   :  { %v974_v17 = vadd.f32 %v973_v7, %v944_v6 }
 0x2fb   :  { %v1006_v8 = vpop.f32.mrf.mxu0 }
 0x2fc   :  { %v1007_v20 = vadd.f32 %v1006_v8, %v974_v17 }
 0x2fd   :  { %v917_v1 = vpop.f32.mrf.mxu1 }
 0x2fe   :  { %v918_v13 = vadd.f32 %v917_v1, %v882_v57 }
 0x300   :  { %v949_v21 = vadd.f32 %v948_v22, %v918_v13 }
 0x302   :  { %v980_v26 = vadd.f32 %v979_v49, %v949_v21 }
 0x303   :  { %v1010_v55 = vpop.f32.mrf.mxu0 }
 0x304   :  { %v1011_v32 = vadd.f32 %v1010_v55, %v980_v26 }
 0x305   :  { %v1033_v23 = vpop.f32.mrf.mxu1 }
 0x306   :  { %v1034_v19 = vadd.f32 %v1033_v23, %v1007_v20 }
 0x308   :  { %v1040_v48 = vsub.f32 %v844_v29, %v1034_v19 }
 0x30a   :  { %v1042_v27 = vmul.f32 0.5, %v1040_v48 }
 0x30c   :  { %1322 = vtanh.f32 %v1042_v27 }
 0x30d   :  { %v1037_v33 = vpop.f32.mrf.mxu1 }
 0x30e   :  { %v1038_v36 = vadd.f32 %v1037_v33, %v1011_v32 }
 0x310   :  { %v1041_v37 = vsub.f32 %v848_v34, %v1038_v36 }
 0x312   :  { %v1323_v38 = vpop.eup %1322  ;;  %v1043_v39 = vmul.f32 0.5, %v1041_v37 }
 0x313   :  { %v1680_v42 = vmax.f32 %v1323_v38, 0.0 }
 0x314   :  { %1324 = vtanh.f32 %v1043_v39 }
 0x315   :  { %v1048_v43 = vsel %vm52_vm0, %v1680_v42, -inf }
 0x316   :  { %1049 = vmax.xlane.f32.xlu2 %v1048_v43 }
 0x31a   :  { %v1325_v44 = vpop.eup %1324 }
 0x31b   :  { %v1684_v45 = vmax.f32 %v1325_v44, 0.0 }
 0x31d   :  { %v1051_v46 = vsel %vm52_vm0, %v1684_v45, -inf }
 0x31e   :  { %1052 = vmax.xlane.f32.xlu2 %v1051_v46 }
 0x389   :  { %v1050_v47 = vpop.xlane.xlu2 %1049 }
 0x38a   :  { %vm1054_vm4 = vcmp.ge.f32.partialorder %v1680_v42, %v1050_v47 }
 0x38b   :  { %v1056_v50 = vsel %vm1054_vm4, %v1428_v16, 16 }
 0x38c   :  { %v1058_v51 = vsel %vm52_vm0, %v1056_v50, 2147483647 }
 0x38d   :  { %v1060_v62 = vshra.s32 %v1058_v51, 16  ;;  %v1059_v14 = vand.u32 65535, %v1058_v51 }
 0x38f   :  { %v1062_v63 = vcvt.s32.f32 %v1060_v62  ;;  %v1061_v28 = vcvt.s32.f32 %v1059_v14 }
 0x391   :  { %1063 = vmin.xlane.f32.xlu0 %v1062_v63  ;;  %v1053_v3 = vpop.xlane.xlu2 %1052 }
 0x392   :  { %vm1055_vm5 = vcmp.ge.f32.partialorder %v1684_v45, %v1053_v3 }
 0x393   :  { %v1057_v4 = vsel %vm1055_vm5, %v1428_v16, 16 }
 0x394   :  { %v1073_v5 = vsel %vm52_vm0, %v1057_v4, 2147483647 }
 0x395   :  { %v1075_v9 = vshra.s32 %v1073_v5, 16  ;;  %v1074_v31 = vand.u32 65535, %v1073_v5 }
 0x397   :  { %v1077_v10 = vcvt.s32.f32 %v1075_v9  ;;  %v1076_v40 = vcvt.s32.f32 %v1074_v31 }
 0x399   :  { %1078 = vmin.xlane.f32.xlu1 %v1077_v10 }
 0x404   :  { %v1064_v15 = vpop.xlane.xlu0 %1063 }
 0x405   :  { %vm1065_vm6 = vcmp.eq.f32.partialorder %v1062_v63, %v1064_v15  ;;  %v1070_v52 = vcvt.f32.s32 %v1064_v15 }
 0x406   :  { %v1066_v30 = vsel %vm1065_vm6, %v1061_v28, inf }
 0x407   :  { %1067 = vmin.xlane.f32.xlu2 %v1066_v30  ;;  %v1071_v54 = vshll.u32 %v1070_v52, 16 }
 0x40c   :  { %v1079_v35 = vpop.xlane.xlu1 %1078 }
 0x40d   :  { %vm1080_vm7 = vcmp.eq.f32.partialorder %v1077_v10, %v1079_v35  ;;  %v1085_v58 = vcvt.f32.s32 %v1079_v35 }
 0x40e   :  { %v1081_v41 = vsel %vm1080_vm7, %v1076_v40, inf }
 0x40f   :  { %1082 = vmin.xlane.f32.xlu2 %v1081_v41  ;;  %v1086_v0 = vshll.u32 %v1085_v58, 16 }
 0x47a   :  { %v1068_v53 = vpop.xlane.xlu2 %1067 }
 0x47b   :  { %v1069_v56 = vcvt.f32.s32 %v1068_v53 }
 0x47d   :  { %v1694_v57 = vadd.s32 %v1071_v54, %v1069_v56 }
 0x47f   :  { %vm1088_vm8 = vcmp.eq.s32.totalorder %v1428_v16, %v1694_v57 }
 0x480   :  { %v1090_v59 = vsel %vm1088_vm8, -1.0, %v1680_v42 }
 0x481   :  { %v1092_v60 = vsel %vm52_vm0, %v1090_v59, -inf }
 0x482   :  { %1093 = vmax.xlane.f32.xlu2 %v1092_v60  ;;  %v1083_v61 = vpop.xlane.xlu2 %1082 }
 0x483   :  { %v1084_v1 = vcvt.f32.s32 %v1083_v61 }
 0x485   :  { %v1703_v2 = vadd.s32 %v1086_v0, %v1084_v1 }
 0x487   :  { %vm1089_vm9 = vcmp.eq.s32.totalorder %v1428_v16, %v1703_v2 }
 0x488   :  { %v1091_v6 = vsel %vm1089_vm9, -1.0, %v1684_v45 }
 0x489   :  { %v1095_v7 = vsel %vm52_vm0, %v1091_v6, -inf }
 0x48a   :  { %1096 = vmax.xlane.f32.xlu2 %v1095_v7 }
 0x4f5   :  { %v1094_v8 = vpop.xlane.xlu2 %1093 }
 0x4f6   :  { %vm1098_vm10 = vcmp.ge.f32.partialorder %v1090_v59, %v1094_v8 }
 0x4f7   :  { %v1100_v11 = vsel %vm1098_vm10, %v1428_v16, 16 }
 0x4f8   :  { %v1102_v12 = vsel %vm52_vm0, %v1100_v11, 2147483647 }
 0x4f9   :  { %v1104_v13 = vshra.s32 %v1102_v12, 16  ;;  %v1103_v21 = vand.u32 65535, %v1102_v12 }
 0x4fb   :  { %v1106_v17 = vcvt.s32.f32 %v1104_v13  ;;  %v1105_v19 = vcvt.s32.f32 %v1103_v21 }
 0x4fd   :  { %1107 = vmin.xlane.f32.xlu2 %v1106_v17  ;;  %v1097_v18 = vpop.xlane.xlu2 %1096 }
 0x4fe   :  { %vm1099_vm11 = vcmp.ge.f32.partialorder %v1091_v6, %v1097_v18 }
 0x4ff   :  { %v1101_v20 = vsel %vm1099_vm11, %v1428_v16, 16 }
 0x500   :  { %v1117_v22 = vsel %vm52_vm0, %v1101_v20, 2147483647 }
 0x501   :  { %v1119_v23 = vshra.s32 %v1117_v22, 16  ;;  %v1118_v49 = vand.u32 65535, %v1117_v22 }
 0x503   :  { %v1121_v24 = vcvt.s32.f32 %v1119_v23  ;;  %v1120_v25 = vcvt.s32.f32 %v1118_v49 }
 0x505   :  { %1122 = vmin.xlane.f32.xlu2 %v1121_v24 }
 0x570   :  { %v1108_v29 = vpop.xlane.xlu2 %1107 }
 0x571   :  { %vm1109_vm12 = vcmp.eq.f32.partialorder %v1106_v17, %v1108_v29  ;;  %v1114_v27 = vcvt.f32.s32 %v1108_v29 }
 0x572   :  { %v1110_v48 = vsel %vm1109_vm12, %v1105_v19, inf }
 0x573   :  { %1111 = vmin.xlane.f32.xlu0 %v1110_v48  ;;  %v1115_v33 = vshll.u32 %v1114_v27, 16 }
 0x578   :  { %v1123_v55 = vpop.xlane.xlu2 %1122 }
 0x579   :  { %vm1124_vm13 = vcmp.eq.f32.partialorder %v1121_v24, %v1123_v55  ;;  %v1129_v37 = vcvt.f32.s32 %v1123_v55 }
 0x57a   :  { %v1125_v26 = vsel %vm1124_vm13, %v1120_v25, inf }
 0x57b   :  { %1126 = vmin.xlane.f32.xlu1 %v1125_v26  ;;  %v1130_v44 = vshll.u32 %v1129_v37, 16 }
 0x5e6   :  { %v1112_v32 = vpop.xlane.xlu0 %1111 }
 0x5e7   :  { %v1113_v34 = vcvt.f32.s32 %v1112_v32 }
 0x5e9   :  { %v1116_v36 = vadd.s32 %v1115_v33, %v1113_v34 }
 0x5eb   :  { %vm1132_vm14 = vcmp.eq.s32.totalorder %v1428_v16, %v1116_v36 }
 0x5ec   :  { %v1136_v38 = vsel %vm1132_vm14, -1.0, %v1090_v59  ;;  %vm1134_vm5 = vmor %vm1088_vm8, %vm1132_vm14 }
 0x5ed   :  { %v1138_v39 = vsel %vm52_vm0, %v1136_v38, -inf }
 0x5ee   :  { %1139 = vmax.xlane.f32.xlu2 %v1138_v39  ;;  %v1127_v43 = vpop.xlane.xlu1 %1126 }
 0x5ef   :  { %v1128_v46 = vcvt.f32.s32 %v1127_v43 }
 0x5f1   :  { %v1131_v47 = vadd.s32 %v1130_v44, %v1128_v46 }
 0x5f3   :  { %vm1133_vm15 = vcmp.eq.s32.totalorder %v1428_v16, %v1131_v47 }
 0x5f4   :  { %v1137_v50 = vsel %vm1133_vm15, -1.0, %v1091_v6  ;;  %vm1135_vm8 = vmor %vm1089_vm9, %vm1133_vm15 }
 0x5f5   :  { %v1141_v51 = vsel %vm52_vm0, %v1137_v50, -inf }
 0x5f6   :  { %1142 = vmax.xlane.f32.xlu0 %v1141_v51 }
 0x661   :  { %v1140_v62 = vpop.xlane.xlu2 %1139 }
 0x662   :  { %vm1144_vm1 = vcmp.ge.f32.partialorder %v1136_v38, %v1140_v62 }
 0x663   :  { %v1146_v63 = vsel %vm1144_vm1, %v1428_v16, 16 }
 0x664   :  { %v1148_v3 = vsel %vm52_vm0, %v1146_v63, 2147483647 }
 0x665   :  { %v1150_v4 = vshra.s32 %v1148_v3, 16  ;;  %v1149_v30 = vand.u32 65535, %v1148_v3 }
 0x667   :  { %v1152_v5 = vcvt.s32.f32 %v1150_v4  ;;  %v1151_v35 = vcvt.s32.f32 %v1149_v30 }
 0x669   :  { %v1143_v9 = vpop.xlane.xlu0 %1142  ;;  %1153 = vmin.xlane.f32.xlu1 %v1152_v5 }
 0x66a   :  { %vm1145_vm2 = vcmp.ge.f32.partialorder %v1137_v50, %v1143_v9 }
 0x66b   :  { %v1147_v10 = vsel %vm1145_vm2, %v1428_v16, 16 }
 0x66c   :  { %v1163_v14 = vsel %vm52_vm0, %v1147_v10, 2147483647 }
 0x66d   :  { %v1165_v15 = vshra.s32 %v1163_v14, 16  ;;  %v1164_v41 = vand.u32 65535, %v1163_v14 }
 0x66f   :  { %v1167_v28 = vcvt.s32.f32 %v1165_v15  ;;  %v1166_v53 = vcvt.s32.f32 %v1164_v41 }
 0x671   :  { %1168 = vmin.xlane.f32.xlu2 %v1167_v28 }
 0x6dc   :  { %v1154_v31 = vpop.xlane.xlu1 %1153 }
 0x6dd   :  { %vm1155_vm3 = vcmp.eq.f32.partialorder %v1152_v5, %v1154_v31  ;;  %v1160_v56 = vcvt.f32.s32 %v1154_v31 }
 0x6de   :  { %v1156_v40 = vsel %vm1155_vm3, %v1151_v35, inf }
 0x6df   :  { %1157 = vmin.xlane.f32.xlu0 %v1156_v40  ;;  %v1161_v59 = vshll.u32 %v1160_v56, 16 }
 0x6e4   :  { %v1169_v52 = vpop.xlane.xlu2 %1168 }
 0x6e5   :  { %vm1170_vm4 = vcmp.eq.f32.partialorder %v1167_v28, %v1169_v52  ;;  %v1175_v0 = vcvt.f32.s32 %v1169_v52 }
 0x6e6   :  { %v1171_v54 = vsel %vm1170_vm4, %v1166_v53, inf }
 0x6e7   :  { %1172 = vmin.xlane.f32.xlu1 %v1171_v54  ;;  %v1176_v11 = vshll.u32 %v1175_v0, 16 }
 0x752   :  { %v1158_v58 = vpop.xlane.xlu0 %1157 }
 0x753   :  { %v1159_v60 = vcvt.f32.s32 %v1158_v58 }
 0x755   :  { %v1162_v61 = vadd.s32 %v1161_v59, %v1159_v60 }
 0x757   :  { %vm1178_vm6 = vcmp.eq.s32.totalorder %v1428_v16, %v1162_v61 }
 0x758   :  { %v1182_v1 = vsel %vm1178_vm6, -1.0, %v1136_v38  ;;  %vm1734_vm7 = vmor %vm1134_vm5, %vm1178_vm6 }
 0x759   :  { %v1184_v7 = vsel %vm52_vm0, %v1182_v1, -inf }
 0x75a   :  { %1185 = vmax.xlane.f32.xlu2 %v1184_v7  ;;  %v1173_v8 = vpop.xlane.xlu1 %1172 }
 0x75b   :  { %v1174_v12 = vcvt.f32.s32 %v1173_v8 }
 0x75d   :  { %v1177_v13 = vadd.s32 %v1176_v11, %v1174_v12 }
 0x75f   :  { %vm1179_vm10 = vcmp.eq.s32.totalorder %v1428_v16, %v1177_v13 }
 0x760   :  { %v1183_v57 = vsel %vm1179_vm10, -1.0, %v1137_v50  ;;  %vm1745_vm11 = vmor %vm1135_vm8, %vm1179_vm10 }
 0x761   :  { %v1187_v18 = vsel %vm52_vm0, %v1183_v57, -inf }
 0x762   :  { %1188 = vmax.xlane.f32.xlu0 %v1187_v18 }
 0x7cd   :  { %v1186_v20 = vpop.xlane.xlu2 %1185 }
 0x7ce   :  { %vm1190_vm12 = vcmp.ge.f32.partialorder %v1182_v1, %v1186_v20 }
 0x7cf   :  { %v1192_v22 = vsel %vm1190_vm12, %v1428_v16, 16 }
 0x7d0   :  { %v1194_v23 = vsel %vm52_vm0, %v1192_v22, 2147483647 }
 0x7d1   :  { %v1196_v24 = vshra.s32 %v1194_v23, 16  ;;  %v1195_v55 = vand.u32 65535, %v1194_v23 }
 0x7d3   :  { %v1198_v21 = vcvt.s32.f32 %v1196_v24  ;;  %v1197_v26 = vcvt.s32.f32 %v1195_v55 }
 0x7d5   :  { %v1189_v2 = vpop.xlane.xlu0 %1188  ;;  %1199 = vmin.xlane.f32.xlu1 %v1198_v21 }
 0x7d6   :  { %vm1191_vm9 = vcmp.ge.f32.partialorder %v1183_v57, %v1189_v2 }
 0x7d7   :  { %v1193_v29 = vsel %vm1191_vm9, %v1428_v16, 16 }
 0x7d8   :  { %v1209_v19 = vsel %vm52_vm0, %v1193_v29, 2147483647 }
 0x7d9   :  { %v1211_v48 = vshra.s32 %v1209_v19, 16  ;;  %v1210_v32 = vand.u32 65535, %v1209_v19 }
 0x7db   :  { %v1213_v49 = vcvt.s32.f32 %v1211_v48  ;;  %v1212_v34 = vcvt.s32.f32 %v1210_v32 }
 0x7dd   :  { %1214 = vmin.xlane.f32.xlu2 %v1213_v49 }
 0x848   :  { %v1200_v25 = vpop.xlane.xlu1 %1199 }
 0x849   :  { %vm1201_vm13 = vcmp.eq.f32.partialorder %v1198_v21, %v1200_v25  ;;  %v1206_v37 = vcvt.f32.s32 %v1200_v25 }
 0x84a   :  { %v1202_v27 = vsel %vm1201_vm13, %v1197_v26, inf }
 0x84b   :  { %1203 = vmin.xlane.f32.xlu0 %v1202_v27  ;;  %v1207_v39 = vshll.u32 %v1206_v37, 16 }
 0x850   :  { %v1215_v33 = vpop.xlane.xlu2 %1214 }
 0x851   :  { %vm1216_vm14 = vcmp.eq.f32.partialorder %v1213_v49, %v1215_v33  ;;  %v1221_v46 = vcvt.f32.s32 %v1215_v33 }
 0x852   :  { %v1217_v36 = vsel %vm1216_vm14, %v1212_v34, inf }
 0x853   :  { %1218 = vmin.xlane.f32.xlu1 %v1217_v36  ;;  %v1222_v63 = vshll.u32 %v1221_v46, 16 }
 0x8be   :  { %v1204_v38 = vpop.xlane.xlu0 %1203 }
 0x8bf   :  { %v1205_v43 = vcvt.f32.s32 %v1204_v38 }
 0x8c1   :  { %v1208_v44 = vadd.s32 %v1207_v39, %v1205_v43 }
 0x8c3   :  { %vm1224_vm15 = vcmp.eq.s32.totalorder %v1428_v16, %v1208_v44 }
 0x8c4   :  { %v1228_v47 = vsel %vm1224_vm15, -1.0, %v1182_v1  ;;  %vm1757_vm1 = vmor %vm1734_vm7, %vm1224_vm15 }
 0x8c5   :  { %v1230_v51 = vsel %vm52_vm0, %v1228_v47, -inf }
 0x8c6   :  { %1231 = vmax.xlane.f32.xlu2 %v1230_v51  ;;  %v1219_v62 = vpop.xlane.xlu1 %1218 }
 0x8c7   :  { %v1220_v3 = vcvt.f32.s32 %v1219_v62 }
 0x8c9   :  { %v1223_v4 = vadd.s32 %v1222_v63, %v1220_v3 }
 0x8cb   :  { %vm1225_vm2 = vcmp.eq.s32.totalorder %v1428_v16, %v1223_v4 }
 0x8cc   :  { %v1229_v5 = vsel %vm1225_vm2, -1.0, %v1183_v57  ;;  %vm1765_vm3 = vmor %vm1745_vm11, %vm1225_vm2 }
 0x8cd   :  { %v1233_v10 = vsel %vm52_vm0, %v1229_v5, -inf }
 0x8ce   :  { %1234 = vmax.xlane.f32.xlu0 %v1233_v10 }
 0x939   :  { %v1232_v14 = vpop.xlane.xlu2 %1231 }
 0x93a   :  { %vm1236_vm4 = vcmp.ge.f32.partialorder %v1228_v47, %v1232_v14 }
 0x93b   :  { %v1238_v15 = vsel %vm1236_vm4, %v1428_v16, 16 }
 0x93c   :  { %v1240_v28 = vsel %vm52_vm0, %v1238_v15, 2147483647 }
 0x93d   :  { %v1242_v30 = vshra.s32 %v1240_v28, 16  ;;  %v1241_v54 = vand.u32 65535, %v1240_v28 }
 0x93f   :  { %v1244_v31 = vcvt.s32.f32 %v1242_v30  ;;  %v1243_v58 = vcvt.s32.f32 %v1241_v54 }
 0x941   :  { %v1235_v35 = vpop.xlane.xlu0 %1234  ;;  %1245 = vmin.xlane.f32.xlu1 %v1244_v31 }
 0x942   :  { %vm1237_vm5 = vcmp.ge.f32.partialorder %v1229_v5, %v1235_v35 }
 0x943   :  { %v1239_v40 = vsel %vm1237_vm5, %v1428_v16, 16 }
 0x944   :  { %v1255_v41 = vsel %vm52_vm0, %v1239_v40, 2147483647 }
 0x945   :  { %v1257_v52 = vshra.s32 %v1255_v41, 16  ;;  %v1256_v60 = vand.u32 65535, %v1255_v41 }
 0x947   :  { %v1259_v53 = vcvt.s32.f32 %v1257_v52  ;;  %v1258_v0 = vcvt.s32.f32 %v1256_v60 }
 0x949   :  { %1260 = vmin.xlane.f32.xlu2 %v1259_v53 }
 0x9b4   :  { %v1246_v56 = vpop.xlane.xlu1 %1245 }
 0x9b5   :  { %vm1247_vm6 = vcmp.eq.f32.partialorder %v1244_v31, %v1246_v56  ;;  %v1252_v6 = vcvt.f32.s32 %v1246_v56 }
 0x9b6   :  { %v1248_v59 = vsel %vm1247_vm6, %v1243_v58, inf }
 0x9b7   :  { %1249 = vmin.xlane.f32.xlu0 %v1248_v59  ;;  %v1253_v8 = vshll.u32 %v1252_v6, 16 }
 0x9bc   :  { %v1261_v61 = vpop.xlane.xlu2 %1260 }
 0x9bd   :  { %vm1262_vm7 = vcmp.eq.f32.partialorder %v1259_v53, %v1261_v61  ;;  %v1267_v13 = vcvt.f32.s32 %v1261_v61 }
 0x9be   :  { %v1263_v1 = vsel %vm1262_vm7, %v1258_v0, inf }
 0x9bf   :  { %1264 = vmin.xlane.f32.xlu1 %v1263_v1  ;;  %v1268_v18 = vshll.u32 %v1267_v13, 16 }
 0xa2a   :  { %v1250_v7 = vpop.xlane.xlu0 %1249 }
 0xa2b   :  { %v1251_v11 = vcvt.f32.s32 %v1250_v7 }
 0xa2d   :  { %v1254_v12 = vadd.s32 %v1253_v8, %v1251_v11 }
 0xa2f   :  { %vm1270_vm8 = vcmp.eq.s32.totalorder %v1428_v16, %v1254_v12 }
 0xa30   :  { %vm1272_vm10 = vmor %vm1757_vm1, %vm1270_vm8 }
 0xa31   :  { %v1274_v57 = vsel %vm1272_vm10, %v1680_v42, 0.0 }
 0xa32   :  { %1276 = vst.msk [vmem:[#allocation5] sm:$0xff] %vm52_vm0, %v1274_v57  ;;  %v1265_v17 = vpop.xlane.xlu1 %1264 }
 0xa33   :  { %v1266_v20 = vcvt.f32.s32 %v1265_v17 }
 0xa35   :  { %v1269_v22 = vadd.s32 %v1268_v18, %v1266_v20 }
 0xa37   :  { %vm1271_vm11 = vcmp.eq.s32.totalorder %v1428_v16, %v1269_v22 }
 0xa38   :  { %vm1273_vm12 = vmor %vm1765_vm3, %vm1271_vm11 }
 0xa39   :  { %v1275_v42 = vsel %vm1273_vm12, %v1684_v45, 0.0 }
 0xa3a   :  { %1277 = vst.msk [vmem:[#allocation5 + $0x8] sm:$0xff] %vm52_vm0, %v1275_v42 }
 0xa3b   :  { %1290 = dma.vmem_to_hbm [thread:$0]  %s1283_s30, 256, %s1285_s7, [#allocation4], %s1379_s20, %s1379_s20, %s1380_s21  }
 0xa3c   :  { %1376 = dma.done.wait [#allocation4], 256  }
 0xa3d   :  { %1377 = vsyncadd [#allocation4], 4294967040 }
 0xa3e   :  { %1295 = vsyncpa [#allocation3], 1 }
 0xa3f   :  { %1296 = vsyncpa [#allocation4], 1 }

</bundles_post_ra>
